<compile_context>
chip_gen: v7x
topology: tpu7x:2x2x1
jax: 0.10.0
libtpu: 0.0.40
codegen_flags: <defaults>
</compile_context>

<pallas_src>
import functools

import jax
import jax.numpy as jnp
from jax import lax
from jax.experimental import pallas as pl
from jax.experimental.pallas import tpu as pltpu


def _propagation_kernel(x_ref, o_ref, *, filter_size, horizontal, s_blk,
                        s_total, tail_guard):
    """One grid step: emit filter_size shifted copies of each sample plane.

    x_ref block:  (1, s_blk, R, C)
    o_ref block:  (1, s_blk * filter_size, R, C)
    horizontal -> shift along C (lanes); vertical -> shift along R (sublanes).
    """
    _, _, R, C = x_ref.shape
    pad = filter_size // 2
    dtype = x_ref.dtype

    # Hoisted edge-zero fillers: built once, reused by every unrolled j/c.
    if pad > 0:
        if horizontal:
            edge_zeros = {d: jnp.zeros((R, d), dtype) for d in range(1, pad + 1)}
        else:
            edge_zeros = {d: jnp.zeros((d, C), dtype) for d in range(1, pad + 1)}

    def emit_plane(j):
        x = x_ref[0, j]                          # (R, C), loaded once per plane
        for c in range(filter_size):
            idx = j * filter_size + c
            d = c - pad                          # out[., p] = x[., p + d]
            if d == 0:
                o_ref[0, idx] = x
            elif horizontal:
                if d > 0:                        # shift left, zero right edge
                    o_ref[0, idx, :, :C - d] = x[:, d:]
                    o_ref[0, idx, :, C - d:] = edge_zeros[d]
                else:                            # shift right, zero left edge
                    k = -d
                    o_ref[0, idx, :, k:] = x[:, :C - k]
                    o_ref[0, idx, :, :k] = edge_zeros[k]
            else:
                if d > 0:                        # shift up, zero bottom rows
                    o_ref[0, idx, :R - d, :] = x[d:, :]
                    o_ref[0, idx, R - d:, :] = edge_zeros[d]
                else:                            # shift down, zero top rows
                    k = -d
                    o_ref[0, idx, k:, :] = x[:R - k, :]
                    o_ref[0, idx, :k, :] = edge_zeros[k]

    if tail_guard:
        # Last S-block may be partial (grid uses cdiv): skip padded planes.
        s_base = pl.program_id(1) * s_blk
        for j in range(s_blk):
            @pl.when(s_base + j < s_total)
            def _(j=j):
                emit_plane(j)
    else:
        for j in range(s_blk):
            emit_plane(j)


_S_BLK_CAP = 8                    # static-unroll cap (code size / live ranges)
_TARGET_STEP_BYTES = 24 << 20     # per-step double-buffered footprint target
_MIN_BLOCK_BYTES = 1 << 20        # don't split blocks below ~1 MiB


def _choose_tiling(B, S, H, W, fs, horizontal, dtype_bytes):
    """Pick (s_blk, spatial_blk, vmem_limit_bytes)."""
    plane = H * W * dtype_bytes

    # (1) sample planes per step: double-buffered input (1x) + output (fs x).
    per_sample = 2 * (1 + fs) * plane
    s_blk = max(1, min(S, _S_BLK_CAP, _TARGET_STEP_BYTES // per_sample))

    # (2) spatial split on the axis orthogonal to the shift direction so the
    #     shift stays inside a block.  Candidates obey the (8,128) rule:
    #     multiples of 8 on H (sublanes) / 128 on W (lanes), or full extent.
    axis = H if horizontal else W
    align = 8 if horizontal else 128
    cands = sorted({axis} | {d for d in range(align, axis, align) if axis % d == 0},
                   reverse=True)

    def blk_plane_bytes(sp):
        return (sp * W if horizontal else H * sp) * dtype_bytes

    def footprint(sp):
        # Double-buffered in+out blocks, plus slack for values the statically
        # unrolled loop keeps live (the plane + up to fs shifted copies).
        return (2 * (1 + fs) * s_blk + (fs + 2)) * blk_plane_bytes(sp)

    sp_blk = cands[0]
    for c in cands:
        sp_blk = c
        if footprint(c) <= _TARGET_STEP_BYTES:
            break

    # (3) ensure enough grid steps for pipelining / v7x's two TensorCores,
    #     as long as blocks stay reasonably large.
    def n_steps(sp):
        return B * ((S + s_blk - 1) // s_blk) * (axis // sp)

    if n_steps(sp_blk) < 4:
        for c in cands:
            if (c < sp_blk and n_steps(c) >= 4
                    and (1 + fs) * s_blk * blk_plane_bytes(c) >= _MIN_BLOCK_BYTES):
                sp_blk = c
                break

    # (4) scoped VMEM limit: cover the real footprint with margin, but stay
    #     well under physical VMEM (64 MiB/TC on v7x) for compiler scratch.
    try:
        phys = int(pltpu.get_tpu_info().vmem_capacity_bytes)
    except Exception:
        # Hardware introspection unavailable -> conservative v7x per-TC value.
        phys = 64 << 20
    vmem_limit = int(min(max(32 << 20, 2 * footprint(sp_blk) + (8 << 20)),
                         phys - (4 << 20)))
    return s_blk, sp_blk, vmem_limit


def propagation(disparity_samples, filter_size=3, propagation_type="horizontal"):
    """Pallas implementation of Propagation.forward.

    disparity_samples: (B, S, H, W) float array
    returns: (B, S * filter_size, H, W)
    """
    assert filter_size % 2 == 1, "filter_size must be odd (PyTorch padding semantics)"
    B, S, H, W = disparity_samples.shape
    fs = filter_size
    horizontal = propagation_type == "horizontal"
    dtype_bytes = jnp.dtype(disparity_samples.dtype).itemsize

    s_blk, sp_blk, vmem_limit = _choose_tiling(B, S, H, W, fs, horizontal,
                                               dtype_bytes)
    n_s = pl.cdiv(S, s_blk)

    if horizontal:
        n_sp = H // sp_blk
        in_block = (1, s_blk, sp_blk, W)
        out_block = (1, s_blk * fs, sp_blk, W)
        index_map = lambda b, sb, hb: (b, sb, hb, 0)
    else:
        n_sp = W // sp_blk
        in_block = (1, s_blk, H, sp_blk)
        out_block = (1, s_blk * fs, H, sp_blk)
        index_map = lambda b, sb, wb: (b, sb, 0, wb)

    kernel = functools.partial(
        _propagation_kernel,
        filter_size=fs,
        horizontal=horizontal,
        s_blk=s_blk,
        s_total=S,
        tail_guard=(S % s_blk != 0),
    )

    # Pure data movement: 1 read + fs writes per input element.
    cost = pl.CostEstimate(
        flops=0,
        transcendentals=0,
        bytes_accessed=(1 + fs) * B * S * H * W * dtype_bytes,
    )

    return pl.pallas_call(
        kernel,
        out_shape=jax.ShapeDtypeStruct((B, S * fs, H, W),
                                       disparity_samples.dtype),
        grid_spec=pltpu.PrefetchScalarGridSpec(
            num_scalar_prefetch=0,
            grid=(B, n_s, n_sp),
            in_specs=[pl.BlockSpec(in_block, index_map)],
            out_specs=pl.BlockSpec(out_block, index_map),
        ),
        compiler_params=pltpu.CompilerParams(
            dimension_semantics=("parallel", "parallel", "parallel"),
            vmem_limit_bytes=vmem_limit,
        ),
        cost_estimate=cost,
    )(disparity_samples)


def propagation_ref(x, filter_size=3, propagation_type="horizontal"):
    """Plain-JAX reference matching the PyTorch conv3d + permute + view."""
    B, S, H, W = x.shape
    pad = filter_size // 2
    outs = []
    for c in range(filter_size):
        if propagation_type == "horizontal":
            padded = jnp.pad(x, ((0, 0), (0, 0), (0, 0), (pad, pad)))
            shifted = lax.dynamic_slice_in_dim(padded, c, W, axis=3)
        else:
            padded = jnp.pad(x, ((0, 0), (0, 0), (pad, pad), (0, 0)))
            shifted = lax.dynamic_slice_in_dim(padded, c, H, axis=2)
        outs.append(shifted)
    stacked = jnp.stack(outs, axis=2)  # (B, S, fs, H, W)
    return stacked.reshape(B, S * filter_size, H, W)


if __name__ == "__main__":
    key = jax.random.PRNGKey(0)
    B, S, H, W = 2, 4, 16, 16
    x = jax.random.normal(key, (B, S, H, W), dtype=jnp.float32)

    ok = True
    for ptype in ("horizontal", "vertical"):
        out = jax.block_until_ready(
            propagation(x, filter_size=3, propagation_type=ptype))
        ref = propagation_ref(x, filter_size=3, propagation_type=ptype)
        if out.shape != (B, S * 3, H, W):
            ok = False
        if not bool(jnp.allclose(out, ref, atol=1e-6)):
            ok = False

    if ok:
        print("KERNEL_OK")
</pallas_src>

<mosaic_0001>
module attributes {stable_mosaic.version = 11 : i64} {
  func.func @_propagation_kernel(%arg0: i32, %arg1: i32, %arg2: i32, %arg3: memref<1x4x16x16xf32, #tpu.memory_space<vmem>>, %arg4: memref<1x12x16x16xf32, #tpu.memory_space<vmem>>) attributes {dimension_semantics = [#tpu.dimension_semantics<parallel>, #tpu.dimension_semantics<parallel>, #tpu.dimension_semantics<parallel>], iteration_bounds = array<i64: 2, 1, 1>, scalar_prefetch = 0 : i64, scratch_operands = 0 : i64, tpu.core_type = #tpu.core_type<tc>, window_params = [{transform_indices = @transform_0, window_bounds = array<i64: 1, 4, 16, 16>}, {transform_indices = @transform_1, window_bounds = array<i64: 1, 12, 16, 16>}]} {
    %cst = arith.constant 0.000000e+00 : f32
    %0 = vector.broadcast %cst : f32 to vector<16x1xf32>
    %c0 = arith.constant 0 : index
    %c0_0 = arith.constant 0 : index
    %c0_1 = arith.constant 0 : index
    %c0_2 = arith.constant 0 : index
    %1 = vector.load %arg3[%c0, %c0_0, %c0_1, %c0_2] : memref<1x4x16x16xf32, #tpu.memory_space<vmem>>, vector<1x1x16x16xf32>
    %2 = vector.shape_cast %1 : vector<1x1x16x16xf32> to vector<16x16xf32>
    %3 = vector.extract_strided_slice %2 {offsets = [0, 0], sizes = [16, 15], strides = [1, 1]} : vector<16x16xf32> to vector<16x15xf32>
    %c0_3 = arith.constant 0 : index
    %c0_4 = arith.constant 0 : index
    %c0_5 = arith.constant 0 : index
    %c1 = arith.constant 1 : index
    %4 = vector.load %arg4[%c0_3, %c0_4, %c0_5, %c1] : memref<1x12x16x16xf32, #tpu.memory_space<vmem>>, vector<1x1x16x15xf32>
    %5 = vector.shape_cast %4 : vector<1x1x16x15xf32> to vector<16x15xf32>
    %6 = vector.shape_cast %3 : vector<16x15xf32> to vector<1x1x16x15xf32>
    tpu.vector_store %arg4[%c0_3, %c0_4, %c0_5, %c1], %6 {strides = array<i32>} : memref<1x12x16x16xf32, #tpu.memory_space<vmem>>, vector<1x1x16x15xf32>,
    %c0_6 = arith.constant 0 : index
    %c0_7 = arith.constant 0 : index
    %c0_8 = arith.constant 0 : index
    %c0_9 = arith.constant 0 : index
    %7 = vector.load %arg4[%c0_6, %c0_7, %c0_8, %c0_9] : memref<1x12x16x16xf32, #tpu.memory_space<vmem>>, vector<1x1x16x1xf32>
    %8 = vector.shape_cast %7 : vector<1x1x16x1xf32> to vector<16x1xf32>
    %9 = vector.shape_cast %0 : vector<16x1xf32> to vector<1x1x16x1xf32>
    tpu.vector_store %arg4[%c0_6, %c0_7, %c0_8, %c0_9], %9 {strides = array<i32>} : memref<1x12x16x16xf32, #tpu.memory_space<vmem>>, vector<1x1x16x1xf32>,
    %c0_10 = arith.constant 0 : index
    %c1_11 = arith.constant 1 : index
    %c0_12 = arith.constant 0 : index
    %c0_13 = arith.constant 0 : index
    %10 = vector.load %arg4[%c0_10, %c1_11, %c0_12, %c0_13] : memref<1x12x16x16xf32, #tpu.memory_space<vmem>>, vector<1x1x16x16xf32>
    %11 = vector.shape_cast %10 : vector<1x1x16x16xf32> to vector<16x16xf32>
    %12 = vector.shape_cast %2 : vector<16x16xf32> to vector<1x1x16x16xf32>
    tpu.vector_store %arg4[%c0_10, %c1_11, %c0_12, %c0_13], %12 {strides = array<i32>} : memref<1x12x16x16xf32, #tpu.memory_space<vmem>>, vector<1x1x16x16xf32>,
    %13 = vector.extract_strided_slice %2 {offsets = [0, 1], sizes = [16, 15], strides = [1, 1]} : vector<16x16xf32> to vector<16x15xf32>
    %c0_14 = arith.constant 0 : index
    %c2 = arith.constant 2 : index
    %c0_15 = arith.constant 0 : index
    %c0_16 = arith.constant 0 : index
    %14 = vector.load %arg4[%c0_14, %c2, %c0_15, %c0_16] : memref<1x12x16x16xf32, #tpu.memory_space<vmem>>, vector<1x1x16x15xf32>
    %15 = vector.shape_cast %14 : vector<1x1x16x15xf32> to vector<16x15xf32>
    %16 = vector.shape_cast %13 : vector<16x15xf32> to vector<1x1x16x15xf32>
    tpu.vector_store %arg4[%c0_14, %c2, %c0_15, %c0_16], %16 {strides = array<i32>} : memref<1x12x16x16xf32, #tpu.memory_space<vmem>>, vector<1x1x16x15xf32>,
    %c0_17 = arith.constant 0 : index
    %c2_18 = arith.constant 2 : index
    %c0_19 = arith.constant 0 : index
    %c15 = arith.constant 15 : index
    %17 = vector.load %arg4[%c0_17, %c2_18, %c0_19, %c15] : memref<1x12x16x16xf32, #tpu.memory_space<vmem>>, vector<1x1x16x1xf32>
    %18 = vector.shape_cast %17 : vector<1x1x16x1xf32> to vector<16x1xf32>
    %19 = vector.shape_cast %0 : vector<16x1xf32> to vector<1x1x16x1xf32>
    tpu.vector_store %arg4[%c0_17, %c2_18, %c0_19, %c15], %19 {strides = array<i32>} : memref<1x12x16x16xf32, #tpu.memory_space<vmem>>, vector<1x1x16x1xf32>,
    %c0_20 = arith.constant 0 : index
    %c1_21 = arith.constant 1 : index
    %c0_22 = arith.constant 0 : index
    %c0_23 = arith.constant 0 : index
    %20 = vector.load %arg3[%c0_20, %c1_21, %c0_22, %c0_23] : memref<1x4x16x16xf32, #tpu.memory_space<vmem>>, vector<1x1x16x16xf32>
    %21 = vector.shape_cast %20 : vector<1x1x16x16xf32> to vector<16x16xf32>
    %22 = vector.extract_strided_slice %21 {offsets = [0, 0], sizes = [16, 15], strides = [1, 1]} : vector<16x16xf32> to vector<16x15xf32>
    %c0_24 = arith.constant 0 : index
    %c3 = arith.constant 3 : index
    %c0_25 = arith.constant 0 : index
    %c1_26 = arith.constant 1 : index
    %23 = vector.load %arg4[%c0_24, %c3, %c0_25, %c1_26] : memref<1x12x16x16xf32, #tpu.memory_space<vmem>>, vector<1x1x16x15xf32>
    %24 = vector.shape_cast %23 : vector<1x1x16x15xf32> to vector<16x15xf32>
    %25 = vector.shape_cast %22 : vector<16x15xf32> to vector<1x1x16x15xf32>
    tpu.vector_store %arg4[%c0_24, %c3, %c0_25, %c1_26], %25 {strides = array<i32>} : memref<1x12x16x16xf32, #tpu.memory_space<vmem>>, vector<1x1x16x15xf32>,
    %c0_27 = arith.constant 0 : index
    %c3_28 = arith.constant 3 : index
    %c0_29 = arith.constant 0 : index
    %c0_30 = arith.constant 0 : index
    %26 = vector.load %arg4[%c0_27, %c3_28, %c0_29, %c0_30] : memref<1x12x16x16xf32, #tpu.memory_space<vmem>>, vector<1x1x16x1xf32>
    %27 = vector.shape_cast %26 : vector<1x1x16x1xf32> to vector<16x1xf32>
    %28 = vector.shape_cast %0 : vector<16x1xf32> to vector<1x1x16x1xf32>
    tpu.vector_store %arg4[%c0_27, %c3_28, %c0_29, %c0_30], %28 {strides = array<i32>} : memref<1x12x16x16xf32, #tpu.memory_space<vmem>>, vector<1x1x16x1xf32>,
    %c0_31 = arith.constant 0 : index
    %c4 = arith.constant 4 : index
    %c0_32 = arith.constant 0 : index
    %c0_33 = arith.constant 0 : index
    %29 = vector.load %arg4[%c0_31, %c4, %c0_32, %c0_33] : memref<1x12x16x16xf32, #tpu.memory_space<vmem>>, vector<1x1x16x16xf32>
    %30 = vector.shape_cast %29 : vector<1x1x16x16xf32> to vector<16x16xf32>
    %31 = vector.shape_cast %21 : vector<16x16xf32> to vector<1x1x16x16xf32>
    tpu.vector_store %arg4[%c0_31, %c4, %c0_32, %c0_33], %31 {strides = array<i32>} : memref<1x12x16x16xf32, #tpu.memory_space<vmem>>, vector<1x1x16x16xf32>,
    %32 = vector.extract_strided_slice %21 {offsets = [0, 1], sizes = [16, 15], strides = [1, 1]} : vector<16x16xf32> to vector<16x15xf32>
    %c0_34 = arith.constant 0 : index
    %c5 = arith.constant 5 : index
    %c0_35 = arith.constant 0 : index
    %c0_36 = arith.constant 0 : index
    %33 = vector.load %arg4[%c0_34, %c5, %c0_35, %c0_36] : memref<1x12x16x16xf32, #tpu.memory_space<vmem>>, vector<1x1x16x15xf32>
    %34 = vector.shape_cast %33 : vector<1x1x16x15xf32> to vector<16x15xf32>
    %35 = vector.shape_cast %32 : vector<16x15xf32> to vector<1x1x16x15xf32>
    tpu.vector_store %arg4[%c0_34, %c5, %c0_35, %c0_36], %35 {strides = array<i32>} : memref<1x12x16x16xf32, #tpu.memory_space<vmem>>, vector<1x1x16x15xf32>,
    %c0_37 = arith.constant 0 : index
    %c5_38 = arith.constant 5 : index
    %c0_39 = arith.constant 0 : index
    %c15_40 = arith.constant 15 : index
    %36 = vector.load %arg4[%c0_37, %c5_38, %c0_39, %c15_40] : memref<1x12x16x16xf32, #tpu.memory_space<vmem>>, vector<1x1x16x1xf32>
    %37 = vector.shape_cast %36 : vector<1x1x16x1xf32> to vector<16x1xf32>
    %38 = vector.shape_cast %0 : vector<16x1xf32> to vector<1x1x16x1xf32>
    tpu.vector_store %arg4[%c0_37, %c5_38, %c0_39, %c15_40], %38 {strides = array<i32>} : memref<1x12x16x16xf32, #tpu.memory_space<vmem>>, vector<1x1x16x1xf32>,
    %c0_41 = arith.constant 0 : index
    %c2_42 = arith.constant 2 : index
    %c0_43 = arith.constant 0 : index
    %c0_44 = arith.constant 0 : index
    %39 = vector.load %arg3[%c0_41, %c2_42, %c0_43, %c0_44] : memref<1x4x16x16xf32, #tpu.memory_space<vmem>>, vector<1x1x16x16xf32>
    %40 = vector.shape_cast %39 : vector<1x1x16x16xf32> to vector<16x16xf32>
    %41 = vector.extract_strided_slice %40 {offsets = [0, 0], sizes = [16, 15], strides = [1, 1]} : vector<16x16xf32> to vector<16x15xf32>
    %c0_45 = arith.constant 0 : index
    %c6 = arith.constant 6 : index
    %c0_46 = arith.constant 0 : index
    %c1_47 = arith.constant 1 : index
    %42 = vector.load %arg4[%c0_45, %c6, %c0_46, %c1_47] : memref<1x12x16x16xf32, #tpu.memory_space<vmem>>, vector<1x1x16x15xf32>
    %43 = vector.shape_cast %42 : vector<1x1x16x15xf32> to vector<16x15xf32>
    %44 = vector.shape_cast %41 : vector<16x15xf32> to vector<1x1x16x15xf32>
    tpu.vector_store %arg4[%c0_45, %c6, %c0_46, %c1_47], %44 {strides = array<i32>} : memref<1x12x16x16xf32, #tpu.memory_space<vmem>>, vector<1x1x16x15xf32>,
    %c0_48 = arith.constant 0 : index
    %c6_49 = arith.constant 6 : index
    %c0_50 = arith.constant 0 : index
    %c0_51 = arith.constant 0 : index
    %45 = vector.load %arg4[%c0_48, %c6_49, %c0_50, %c0_51] : memref<1x12x16x16xf32, #tpu.memory_space<vmem>>, vector<1x1x16x1xf32>
    %46 = vector.shape_cast %45 : vector<1x1x16x1xf32> to vector<16x1xf32>
    %47 = vector.shape_cast %0 : vector<16x1xf32> to vector<1x1x16x1xf32>
    tpu.vector_store %arg4[%c0_48, %c6_49, %c0_50, %c0_51], %47 {strides = array<i32>} : memref<1x12x16x16xf32, #tpu.memory_space<vmem>>, vector<1x1x16x1xf32>,
    %c0_52 = arith.constant 0 : index
    %c7 = arith.constant 7 : index
    %c0_53 = arith.constant 0 : index
    %c0_54 = arith.constant 0 : index
    %48 = vector.load %arg4[%c0_52, %c7, %c0_53, %c0_54] : memref<1x12x16x16xf32, #tpu.memory_space<vmem>>, vector<1x1x16x16xf32>
    %49 = vector.shape_cast %48 : vector<1x1x16x16xf32> to vector<16x16xf32>
    %50 = vector.shape_cast %40 : vector<16x16xf32> to vector<1x1x16x16xf32>
    tpu.vector_store %arg4[%c0_52, %c7, %c0_53, %c0_54], %50 {strides = array<i32>} : memref<1x12x16x16xf32, #tpu.memory_space<vmem>>, vector<1x1x16x16xf32>,
    %51 = vector.extract_strided_slice %40 {offsets = [0, 1], sizes = [16, 15], strides = [1, 1]} : vector<16x16xf32> to vector<16x15xf32>
    %c0_55 = arith.constant 0 : index
    %c8 = arith.constant 8 : index
    %c0_56 = arith.constant 0 : index
    %c0_57 = arith.constant 0 : index
    %52 = vector.load %arg4[%c0_55, %c8, %c0_56, %c0_57] : memref<1x12x16x16xf32, #tpu.memory_space<vmem>>, vector<1x1x16x15xf32>
    %53 = vector.shape_cast %52 : vector<1x1x16x15xf32> to vector<16x15xf32>
    %54 = vector.shape_cast %51 : vector<16x15xf32> to vector<1x1x16x15xf32>
    tpu.vector_store %arg4[%c0_55, %c8, %c0_56, %c0_57], %54 {strides = array<i32>} : memref<1x12x16x16xf32, #tpu.memory_space<vmem>>, vector<1x1x16x15xf32>,
    %c0_58 = arith.constant 0 : index
    %c8_59 = arith.constant 8 : index
    %c0_60 = arith.constant 0 : index
    %c15_61 = arith.constant 15 : index
    %55 = vector.load %arg4[%c0_58, %c8_59, %c0_60, %c15_61] : memref<1x12x16x16xf32, #tpu.memory_space<vmem>>, vector<1x1x16x1xf32>
    %56 = vector.shape_cast %55 : vector<1x1x16x1xf32> to vector<16x1xf32>
    %57 = vector.shape_cast %0 : vector<16x1xf32> to vector<1x1x16x1xf32>
    tpu.vector_store %arg4[%c0_58, %c8_59, %c0_60, %c15_61], %57 {strides = array<i32>} : memref<1x12x16x16xf32, #tpu.memory_space<vmem>>, vector<1x1x16x1xf32>,
    %c0_62 = arith.constant 0 : index
    %c3_63 = arith.constant 3 : index
    %c0_64 = arith.constant 0 : index
    %c0_65 = arith.constant 0 : index
    %58 = vector.load %arg3[%c0_62, %c3_63, %c0_64, %c0_65] : memref<1x4x16x16xf32, #tpu.memory_space<vmem>>, vector<1x1x16x16xf32>
    %59 = vector.shape_cast %58 : vector<1x1x16x16xf32> to vector<16x16xf32>
    %60 = vector.extract_strided_slice %59 {offsets = [0, 0], sizes = [16, 15], strides = [1, 1]} : vector<16x16xf32> to vector<16x15xf32>
    %c0_66 = arith.constant 0 : index
    %c9 = arith.constant 9 : index
    %c0_67 = arith.constant 0 : index
    %c1_68 = arith.constant 1 : index
    %61 = vector.load %arg4[%c0_66, %c9, %c0_67, %c1_68] : memref<1x12x16x16xf32, #tpu.memory_space<vmem>>, vector<1x1x16x15xf32>
    %62 = vector.shape_cast %61 : vector<1x1x16x15xf32> to vector<16x15xf32>
    %63 = vector.shape_cast %60 : vector<16x15xf32> to vector<1x1x16x15xf32>
    tpu.vector_store %arg4[%c0_66, %c9, %c0_67, %c1_68], %63 {strides = array<i32>} : memref<1x12x16x16xf32, #tpu.memory_space<vmem>>, vector<1x1x16x15xf32>,
    %c0_69 = arith.constant 0 : index
    %c9_70 = arith.constant 9 : index
    %c0_71 = arith.constant 0 : index
    %c0_72 = arith.constant 0 : index
    %64 = vector.load %arg4[%c0_69, %c9_70, %c0_71, %c0_72] : memref<1x12x16x16xf32, #tpu.memory_space<vmem>>, vector<1x1x16x1xf32>
    %65 = vector.shape_cast %64 : vector<1x1x16x1xf32> to vector<16x1xf32>
    %66 = vector.shape_cast %0 : vector<16x1xf32> to vector<1x1x16x1xf32>
    tpu.vector_store %arg4[%c0_69, %c9_70, %c0_71, %c0_72], %66 {strides = array<i32>} : memref<1x12x16x16xf32, #tpu.memory_space<vmem>>, vector<1x1x16x1xf32>,
    %c0_73 = arith.constant 0 : index
    %c10 = arith.constant 10 : index
    %c0_74 = arith.constant 0 : index
    %c0_75 = arith.constant 0 : index
    %67 = vector.load %arg4[%c0_73, %c10, %c0_74, %c0_75] : memref<1x12x16x16xf32, #tpu.memory_space<vmem>>, vector<1x1x16x16xf32>
    %68 = vector.shape_cast %67 : vector<1x1x16x16xf32> to vector<16x16xf32>
    %69 = vector.shape_cast %59 : vector<16x16xf32> to vector<1x1x16x16xf32>
    tpu.vector_store %arg4[%c0_73, %c10, %c0_74, %c0_75], %69 {strides = array<i32>} : memref<1x12x16x16xf32, #tpu.memory_space<vmem>>, vector<1x1x16x16xf32>,
    %70 = vector.extract_strided_slice %59 {offsets = [0, 1], sizes = [16, 15], strides = [1, 1]} : vector<16x16xf32> to vector<16x15xf32>
    %c0_76 = arith.constant 0 : index
    %c11 = arith.constant 11 : index
    %c0_77 = arith.constant 0 : index
    %c0_78 = arith.constant 0 : index
    %71 = vector.load %arg4[%c0_76, %c11, %c0_77, %c0_78] : memref<1x12x16x16xf32, #tpu.memory_space<vmem>>, vector<1x1x16x15xf32>
    %72 = vector.shape_cast %71 : vector<1x1x16x15xf32> to vector<16x15xf32>
    %73 = vector.shape_cast %70 : vector<16x15xf32> to vector<1x1x16x15xf32>
    tpu.vector_store %arg4[%c0_76, %c11, %c0_77, %c0_78], %73 {strides = array<i32>} : memref<1x12x16x16xf32, #tpu.memory_space<vmem>>, vector<1x1x16x15xf32>,
    %c0_79 = arith.constant 0 : index
    %c11_80 = arith.constant 11 : index
    %c0_81 = arith.constant 0 : index
    %c15_82 = arith.constant 15 : index
    %74 = vector.load %arg4[%c0_79, %c11_80, %c0_81, %c15_82] : memref<1x12x16x16xf32, #tpu.memory_space<vmem>>, vector<1x1x16x1xf32>
    %75 = vector.shape_cast %74 : vector<1x1x16x1xf32> to vector<16x1xf32>
    %76 = vector.shape_cast %0 : vector<16x1xf32> to vector<1x1x16x1xf32>
    tpu.vector_store %arg4[%c0_79, %c11_80, %c0_81, %c15_82], %76 {strides = array<i32>} : memref<1x12x16x16xf32, #tpu.memory_space<vmem>>, vector<1x1x16x1xf32>,
    return
  }
  func.func @transform_0(%arg0: i32, %arg1: i32, %arg2: i32) -> (i32, i32, i32, i32) {
    %c0_i32 = arith.constant 0 : i32
    %c0_i32_0 = arith.constant 0 : i32
    return %arg0, %arg1, %arg2, %c0_i32 : i32, i32, i32, i32
  }
  func.func @transform_1(%arg0: i32, %arg1: i32, %arg2: i32) -> (i32, i32, i32, i32) {
    %c0_i32 = arith.constant 0 : i32
    %c0_i32_0 = arith.constant 0 : i32
    return %arg0, %arg1, %arg2, %c0_i32 : i32, i32, i32, i32
  }
}

</mosaic_0001>

<bundles_post_ra>
// kernel: tpu_custom_call.1
= control target key start
LH: loop header
LB: loop body
LE: loop exit
PB: predicated region body
PF: predicated region fallthrough
CT: control target
= control target key end

     0   :  { %6 = vsyncpa [#allocation3], 0  ;;  %s933_s0 = inlined_call_operand.hbm [shape: f32[2,4,16,16], index: 0, kind: input, shape index: {}]   ;;  %s934_s1 = inlined_call_operand.hbm [shape: f32[2,12,16,16], index: 1, kind: output, shape index: {}]  }
   0x1   :  { %8 = vsyncpa [#allocation3 + $0x1], 0 }
   0x2   :  { %9 = vsyncpa [#allocation4], 0 }
   0x3   :  { %11 = vsyncpa [#allocation4 + $0x1], 0  ;;  %s666_s6 = smov 0   ;;  %s668_s7 = smov 0  }
   0x4   :  { %s670_s8 = smov 0   ;;  %s672_s9 = smov 0  }
   0x5   :  { %s674_s10 = smov 0   ;;  %s676_s11 = smov 0  }
   0x6 LB: > { %s407_s12 = sadd.s32 4294967295, %s645_s11   ;;  %s408_s13 = sadd.s32 4294967294, %s645_s11   ;;  %s645_s11 = sphi %s676_s11, %s17_s11   ;;  %s641_s10 = sphi %s674_s10, %s949_s10   ;;  %s637_s9 = sphi %s672_s9, %s948_s9   ;;  %s633_s8 = sphi %s670_s8, %s947_s8   ;;  %s629_s7 = sphi %s668_s7, %s946_s7   ;;  %s625_s6 = sphi %s666_s6, %s945_s6  }
   0x7   : > { %s36_s14 = sadd.s32 1, %s641_s10  ;;  %s47_s15 = sadd.s32 1, %s633_s8 }
   0x8   : > { %p38_p0 = scmp.ge.s32.totalorder %s36_s14, 2  ;;  %p54_p1 = scmp.ne.s32.totalorder %s633_s8, %s629_s7 }
   0x9   : > { %p55_p2 = scmp.eq.s32.totalorder %s645_s11, 0  ;;  %p60_p3 = scmp.ne.s32.totalorder %s629_s7, %s625_s6 }
   0xa   : > { %s951_s14 = smov (%p38_p0, %s36_s14), 0  ;;  %p61_p5 = scmp.eq.s32.totalorder %s407_s12, 0 }
   0xb   : > { %p707_p4 = por %p55_p2, %p54_p1  ;;  %s40_s17 = ssub.s32 %s641_s10, %s951_s14 }
   0xc   : > { %p88_p6 = scmp.eq.s32.totalorder %s407_s12, 1  ;;  %p45_p7 = scmp.eq.s32.totalorder %s40_s17, 0 }
   0xd   : > { %p713_p8 = por %p61_p5, %p60_p3  ;;  %p94_p10 = scmp.eq.s32.totalorder %s408_s13, 1 }
   0xe   : > { %p717_p9 = por %p88_p6, %p54_p1  ;;  %p476_p13 = scmp.lt.s32.totalorder %s645_s11, 2 }
   0xf   : > { %s722_s20 = scalar_select %p45_p7, %s633_s8, %s47_s15  }
  0x10   : > { %s938_s19 = scalar_select %p717_p9, 1, 0 }
  0x11   : > { %p724_p11 = por %p94_p10, %p60_p3  ;;  %s114_s22 = sand.u32 1, %s633_s8  }
  0x12   : > { %s411_s23 = sshll.u32 %s114_s22, 6  ;;  %s461_s24 = sshll.u32 %s641_s10, 10 }
  0x13   : > { %s939_s21 = scalar_select %p724_p11, 1, 0 }
  0x14   : > { %s735_s27 = scalar_lea.hbm %s933_s0, %s461_s24  ;;  %s118_s28 = scalar_lea.vmem [#allocation2], %s411_s23 }
  0x15   : > { %s130_s29 = sshll.u32 %s118_s28, 4  ;;  %p741_p0 = pnand %p476_p13, %p707_p4  ;;  %s737_s29 = int_to_ptr.vmem [resolvable:$true] %s130_s29 }
  0x16   : > { %s746_s2 = scalar_lea.sflag [#allocation3], %s114_s22  ;;  %s533_s3 = scalar_lea.hbm %s735_s27, 1024 }
  0x17   : > { %p534_p2 = scmp.ne.s32.totalorder %s735_s27, %s533_s3  ;;  %p535_p3 = pneg %p741_p0 }
  0x18   : > { %s538_s12 = scalar_lea.hbm %s933_s0, 2048  ;;  %p539_p4 = scmp.lt.u32.totalorder %s735_s27, %s933_s0 }
  0x19   : > { %p536_p5 = pnand %p535_p3, %p534_p2  ;;  %p540_p7 = scmp.lt.u32.totalorder %s538_s12, %s533_s3 }
  0x1a   : > { %p542_p13 = scmp.lt.u32.totalorder %s533_s3, %s735_s27 }
  0x1b   : > { %p537_p6 = pneg %p536_p5  ;;  %p541_p10 = por %p540_p7, %p539_p4 }
  0x1d   : > { %p543_p12 = por %p542_p13, %p541_p10 }
  0x1f   : > { %p544_p1 = pnand %p543_p12, %p537_p6 }
  0x21   : > { %547 = shalt.err (!%p544_p1)
}
  0x22   : > { %s548_s16 = scalar_lea.vmem %s737_s29, 1024  ;;  %s647_s17 = smov [#allocation2]  }
  0x23   : > { %p549_p2 = scmp.ne.s32.totalorder %s737_s29, %s548_s16  ;;  %s553_s22 = sshll.u32 %s647_s17, 4  ;;  %s554_s22 = int_to_ptr.vmem [resolvable:$false] %s553_s22 }
  0x24   : > { %s555_s23 = scalar_lea.vmem %s554_s22, 2048  ;;  %p556_p9 = scmp.lt.s32.totalorder %s737_s29, %s554_s22 }
  0x25   : > { %p551_p5 = pnand %p549_p2, %p535_p3  ;;  %p557_p4 = scmp.lt.s32.totalorder %s555_s23, %s548_s16 }
  0x27   : > { %p552_p11 = pneg %p551_p5  ;;  %p558_p7 = por %p557_p4, %p556_p9 }
  0x29   : > { %p559_p10 = pnand %p558_p7, %p552_p11 }
  0x2b   : > { %562 = shalt.err (!%p559_p10)
}
  0x2c   : > { %s648_s24 = smov 128   ;;  %s649_s25 = smov 8  }
  0x2d   : > { %471 = dma.hbm_to_vmem [thread:$0]  (!%p741_p0), %s735_s27, 1024, %s737_s29, %s746_s2, %s648_s24, %s648_s24, %s649_s25  }
  0x2e   : > { %p138_p12 = scmp.lt.s32.totalorder %s645_s11, 3  ;;  %p941_p1 = scmp.ge.s32.totalorder %s645_s11, 1 }
  0x30   : > { %p139_p3 = pnand %p941_p1, %p138_p12 }
  0x31   : > { %s778_s26 = sand.u32 (!%p139_p3), 1, %s629_s7  }
  0x32   : > { %142 = sbr.rel (%p139_p3) target bundleno = 219 (0xdb), region = 24  ;;  %s415_s28 = sshll.u32 (!%p139_p3), %s778_s26, 6 }
  0x33   : > { %s145_s3 = scalar_lea.sflag (!%p139_p3), [#allocation3], %s778_s26  ;;  %s148_s4 = scalar_lea.vmem (!%p139_p3), [#allocation2], %s415_s28 }
  0x39   : > { %616 = dma.done.wait (%p713_p8), %s145_s3, 1024  }
  0x3a   : > { %618 = vsyncadd (%p713_p8), %s145_s3, 4294966272  ;;  %s462_s27 = smul.u32 192, %s778_s26  ;;  %vm188_vm0 = vcmask 130048   ;;  %v171_v0 = vld [vmem:[%s148_s4] sm:$0xff]  ;;  %v172_v1 = vld [vmem:[%s148_s4 + $0x8] sm:$0xff]  ;;  %s650_s29 = smov 127  }
  0x3b   : > { %v423_v2 = vld [vmem:[%s148_s4 + $0x18] sm:$0xff]  ;;  %191 = vrot.lane.b32.xlu1 %v171_v0, %s650_s29  ;;  %s651_s18 = smov 1   ;;  %v422_v3 = vld [vmem:[%s148_s4 + $0x10] sm:$0xff]  ;;  %v435_v4 = vld [vmem:[%s148_s4 + $0x28] sm:$0xff]  ;;  %vm198_vm1 = vcmask 121856   ;;  %vm181_vm2 = vcmask 130056  }
  0x3c   : > { %s788_s30 = scalar_lea.vmem [#allocation5], %s462_s27  ;;  %175 = vrot.lane.b32.xlu0 %v171_v0, %s651_s18  ;;  %v434_v5 = vld [vmem:[%s148_s4 + $0x20] sm:$0xff]  ;;  %v447_v6 = vld [vmem:[%s148_s4 + $0x38] sm:$0xff]  ;;  %v446_v7 = vld [vmem:[%s148_s4 + $0x30] sm:$0xff]  ;;  %vm201_vm3 = vcmask 130168   ;;  %vm184_vm4 = vcmask 7168  }
  0x3d   : > { %416 = vst.msk [vmem:[%s788_s30 + $0x10] sm:$0xff] %vm188_vm0, %v171_v0  ;;  %417 = vst.msk [vmem:[%s788_s30 + $0x18] sm:$0xff] %vm188_vm0, %v172_v1  ;;  %v652_v10 = vmov 0.0   ;;  %s463_s2 = smul.u32 3072, %s637_s9  ;;  %s313_s5 = sshll.u32 %s788_s30, 4  ;;  %s876_s5 = int_to_ptr.vmem [resolvable:$true] %s313_s5 }
  0x3e   : > { %429 = vst.msk [vmem:[%s788_s30 + $0x48] sm:$0xff] %vm188_vm0, %v423_v2  ;;  %428 = vst.msk [vmem:[%s788_s30 + $0x40] sm:$0xff] %vm188_vm0, %v422_v3  ;;  %s295_s9 = scalar_lea.sflag [#allocation4], %s778_s26  ;;  %s563_s16 = scalar_lea.vmem %s876_s5, 3072 }
  0x3f   : > { %441 = vst.msk [vmem:[%s788_s30 + $0x78] sm:$0xff] %vm188_vm0, %v435_v4  ;;  %440 = vst.msk [vmem:[%s788_s30 + $0x70] sm:$0xff] %vm188_vm0, %v434_v5  ;;  %193 = vrot.lane.b32.xlu1 %v172_v1, %s650_s29  ;;  %s874_s15 = scalar_lea.hbm %s934_s1, %s463_s2  ;;  %p564_p8 = scmp.ne.s32.totalorder %s876_s5, %s563_s16 }
  0x40   : > { %453 = vst.msk [vmem:[%s788_s30 + $0xa8] sm:$0xff] %vm188_vm0, %v447_v6  ;;  %452 = vst.msk [vmem:[%s788_s30 + $0xa0] sm:$0xff] %vm188_vm0, %v446_v7  ;;  %177 = vrot.lane.b32.xlu0 %v172_v1, %s651_s18  ;;  %p942_p9 = scmp.ne.s32.totalorder %s938_s19, 0  ;;  %s653_s17 = smov [#allocation5]  }
  0x41   : > { %s567_s22 = sshll.u32 %s653_s17, 4  ;;  %s568_s22 = int_to_ptr.vmem [resolvable:$false] %s567_s22 }
  0x42   : > { %p565_p11 = pnand %p564_p8, %p942_p9  ;;  %s569_s23 = scalar_lea.vmem %s568_s22, 6144 }
  0x43   : > { %211 = vrot.lane.b32.xlu1 %v423_v2, %s651_s18  ;;  %p570_p6 = scmp.lt.s32.totalorder %s876_s5, %s568_s22  ;;  %p571_p13 = scmp.lt.s32.totalorder %s569_s23, %s563_s16 }
  0x44   : > { %209 = vrot.lane.b32.xlu0 %v422_v3, %s651_s18  ;;  %p566_p0 = pneg %p565_p11 }
  0x45   : > { %p572_p2 = por %p571_p13, %p570_p6 }
  0x47   : > { %225 = vrot.lane.b32.xlu1 %v423_v2, %s650_s29  ;;  %p573_p5 = pnand %p572_p2, %p566_p0 }
  0x48   : > { %223 = vrot.lane.b32.xlu0 %v422_v3, %s650_s29 }
  0x4b   : > { %241 = vrot.lane.b32.xlu1 %v435_v4, %s651_s18 }
  0x4c   : > { %239 = vrot.lane.b32.xlu0 %v434_v5, %s651_s18 }
  0x4f   : > { %255 = vrot.lane.b32.xlu1 %v435_v4, %s650_s29 }
  0x50   : > { %253 = vrot.lane.b32.xlu0 %v434_v5, %s650_s29 }
  0x53   : > { %271 = vrot.lane.b32.xlu1 %v447_v6, %s651_s18 }
  0x54   : > { %269 = vrot.lane.b32.xlu0 %v446_v7, %s651_s18 }
  0x57   : > { %285 = vrot.lane.b32.xlu1 %v447_v6, %s650_s29 }
  0x58   : > { %283 = vrot.lane.b32.xlu0 %v446_v7, %s650_s29 }
  0xad   : > { %v192_v8 = vpop.permute.xlu1 %191 }
  0xae   : > { %v176_v9 = vpop.permute.xlu0 %175  ;;  %418 = vst.msk [vmem:[%s788_s30 + $0x20] sm:$0xff] %vm198_vm1, %v192_v8 }
  0xaf   : > { %182 = vst.msk [vmem:[%s788_s30] sm:$0xff] %vm181_vm2, %v176_v9 }
  0xb0   : > { %420 = vst.msk [vmem:[%s788_s30 + $0x20] sm:$0xff] %vm201_vm3, %v652_v10 }
  0xb1   : > { %185 = vst.msk [vmem:[%s788_s30] sm:$0xff] %vm184_vm4, %v652_v10  ;;  %v194_v11 = vpop.permute.xlu1 %193 }
  0xb2   : > { %v178_v12 = vpop.permute.xlu0 %177  ;;  %419 = vst.msk [vmem:[%s788_s30 + $0x28] sm:$0xff] %vm198_vm1, %v194_v11 }
  0xb3   : > { %183 = vst.msk [vmem:[%s788_s30 + $0x8] sm:$0xff] %vm181_vm2, %v178_v12 }
  0xb4   : > { %421 = vst.msk [vmem:[%s788_s30 + $0x28] sm:$0xff] %vm201_vm3, %v652_v10 }
  0xb5   : > { %186 = vst.msk [vmem:[%s788_s30 + $0x8] sm:$0xff] %vm184_vm4, %v652_v10  ;;  %v212_v13 = vpop.permute.xlu1 %211 }
  0xb6   : > { %v210_v14 = vpop.permute.xlu0 %209  ;;  %425 = vst.msk [vmem:[%s788_s30 + $0x38] sm:$0xff] %vm181_vm2, %v212_v13 }
  0xb7   : > { %424 = vst.msk [vmem:[%s788_s30 + $0x30] sm:$0xff] %vm181_vm2, %v210_v14 }
  0xb8   : > { %427 = vst.msk [vmem:[%s788_s30 + $0x38] sm:$0xff] %vm184_vm4, %v652_v10  ;;  %426 = vst.msk [vmem:[%s788_s30 + $0x30] sm:$0xff] %vm184_vm4, %v652_v10 }
  0xb9   : > { %v226_v15 = vpop.permute.xlu1 %225 }
  0xba   : > { %v224_v16 = vpop.permute.xlu0 %223  ;;  %431 = vst.msk [vmem:[%s788_s30 + $0x58] sm:$0xff] %vm198_vm1, %v226_v15 }
  0xbb   : > { %430 = vst.msk [vmem:[%s788_s30 + $0x50] sm:$0xff] %vm198_vm1, %v224_v16 }
  0xbc   : > { %433 = vst.msk [vmem:[%s788_s30 + $0x58] sm:$0xff] %vm201_vm3, %v652_v10  ;;  %432 = vst.msk [vmem:[%s788_s30 + $0x50] sm:$0xff] %vm201_vm3, %v652_v10 }
  0xbd   : > { %v242_v17 = vpop.permute.xlu1 %241 }
  0xbe   : > { %v240_v18 = vpop.permute.xlu0 %239  ;;  %437 = vst.msk [vmem:[%s788_s30 + $0x68] sm:$0xff] %vm181_vm2, %v242_v17 }
  0xbf   : > { %436 = vst.msk [vmem:[%s788_s30 + $0x60] sm:$0xff] %vm181_vm2, %v240_v18 }
  0xc0   : > { %439 = vst.msk [vmem:[%s788_s30 + $0x68] sm:$0xff] %vm184_vm4, %v652_v10  ;;  %438 = vst.msk [vmem:[%s788_s30 + $0x60] sm:$0xff] %vm184_vm4, %v652_v10 }
  0xc1   : > { %v256_v19 = vpop.permute.xlu1 %255 }
  0xc2   : > { %v254_v20 = vpop.permute.xlu0 %253  ;;  %443 = vst.msk [vmem:[%s788_s30 + $0x88] sm:$0xff] %vm198_vm1, %v256_v19 }
  0xc3   : > { %442 = vst.msk [vmem:[%s788_s30 + $0x80] sm:$0xff] %vm198_vm1, %v254_v20 }
  0xc4   : > { %445 = vst.msk [vmem:[%s788_s30 + $0x88] sm:$0xff] %vm201_vm3, %v652_v10  ;;  %444 = vst.msk [vmem:[%s788_s30 + $0x80] sm:$0xff] %vm201_vm3, %v652_v10 }
  0xc5   : > { %v272_v21 = vpop.permute.xlu1 %271 }
  0xc6   : > { %v270_v22 = vpop.permute.xlu0 %269  ;;  %449 = vst.msk [vmem:[%s788_s30 + $0x98] sm:$0xff] %vm181_vm2, %v272_v21 }
  0xc7   : > { %448 = vst.msk [vmem:[%s788_s30 + $0x90] sm:$0xff] %vm181_vm2, %v270_v22 }
  0xc8   : > { %451 = vst.msk [vmem:[%s788_s30 + $0x98] sm:$0xff] %vm184_vm4, %v652_v10  ;;  %450 = vst.msk [vmem:[%s788_s30 + $0x90] sm:$0xff] %vm184_vm4, %v652_v10 }
  0xc9   : > { %v286_v23 = vpop.permute.xlu1 %285 }
  0xca   : > { %v284_v24 = vpop.permute.xlu0 %283  ;;  %455 = vst.msk [vmem:[%s788_s30 + $0xb8] sm:$0xff] %vm198_vm1, %v286_v23 }
  0xcb   : > { %454 = vst.msk [vmem:[%s788_s30 + $0xb0] sm:$0xff] %vm198_vm1, %v284_v24 }
  0xcc   : > { %457 = vst.msk [vmem:[%s788_s30 + $0xb8] sm:$0xff] %vm201_vm3, %v652_v10  ;;  %456 = vst.msk [vmem:[%s788_s30 + $0xb0] sm:$0xff] %vm201_vm3, %v652_v10 }
  0xcd   : > { %576 = shalt.err (!%p573_p5)
}
  0xce   : > { %s577_s24 = scalar_lea.hbm %s874_s15, 3072  ;;  %s581_s3 = scalar_lea.hbm %s934_s1, 6144 }
  0xcf   : > { %p578_p4 = scmp.ne.s32.totalorder %s874_s15, %s577_s24  ;;  %p582_p12 = scmp.lt.u32.totalorder %s874_s15, %s934_s1 }
  0xd0   : > { %p583_p1 = scmp.lt.u32.totalorder %s581_s3, %s577_s24  ;;  %p585_p8 = scmp.lt.u32.totalorder %s577_s24, %s874_s15 }
  0xd1   : > { %p579_p7 = pnand %p578_p4, %p942_p9 }
  0xd2   : > { %p584_p3 = por %p583_p1, %p582_p12 }
  0xd3   : > { %p580_p10 = pneg %p579_p7 }
  0xd4   : > { %p586_p11 = por %p585_p8, %p584_p3 }
  0xd6   : > { %p587_p0 = pnand %p586_p11, %p580_p10 }
  0xd8   : > { %590 = shalt.err (!%p587_p0)
}
  0xd9   : > { %s654_s29 = smov 128   ;;  %s655_s30 = smov 8  }
  0xda   : > { %466 = dma.vmem_to_hbm [thread:$0]  (%p942_p9), %s876_s5, 3072, %s874_s15, %s295_s9, %s654_s29, %s654_s29, %s655_s30  }
  0xdb PF: > { %s328_s18 = sand.u32 1, %s625_s6   ;;  %p943_p6 = scmp.ne.s32.totalorder %s939_s21, 0 }
  0xdc   : > { %p944_p13 = scmp.ge.s32.totalorder %s645_s11, 2  ;;  %s329_s2 = scalar_lea.sflag [#allocation4], %s328_s18 }
  0xde   : > { %p473_p2 = pnand %p944_p13, %p943_p6 }
  0xe0   : > { %620 = dma.done.wait (!%p473_p2), %s329_s2, 3072  }
  0xe1   : > { %622 = vsyncadd (!%p473_p2), %s329_s2, 4294964224  ;;  %s17_s11 = sadd.s32 1, %s645_s11   ;;  %s945_s6 = smov %s629_s7 }
  0xe2   : > { %p14_p5 = scmp.ge.s32.totalorder %s17_s11, 4   ;;  %s946_s7 = smov %s633_s8 }
  0xe3   : > { %s947_s8 = smov %s722_s20  ;;  %s948_s9 = smov %s641_s10 }
  0xe4   : > { %s949_s10 = smov %s951_s14  ;;  %16 = sbr.rel (!%p14_p5) target bundleno = 6 (0x6), region = 83 }
  0xeb   :  { %334 = vsyncpa [#allocation3], 1 }
  0xec   :  { %336 = vsyncpa [#allocation3 + $0x1], 1 }
  0xed   :  { %337 = vsyncpa [#allocation4], 1 }
  0xee   :  { %339 = vsyncpa [#allocation4 + $0x1], 1 }

</bundles_post_ra>
